<compile_context>
chip_gen: v7x
topology: tpu7x:2x2x1
jax: 0.10.0
libtpu: 0.0.40
codegen_flags: <defaults>
</compile_context>

<pallas_src>
import functools

import jax
import jax.numpy as jnp
from jax.experimental import pallas as pl
from jax.experimental.pallas import tpu as pltpu

NEG_SLOPE = 0.1
BN_EPS = 1e-5


def _stats_kernel(x_ref, s_ref, w1_ref, w2_ref, csum_ref, csq_ref, *, hw, thw):
    """1x1 conv (channel matmul) + per-channel sum / sum-of-squares."""
    j = pl.program_id(1)

    # (Cout, C1) @ (C1, thw) + (Cout, C2) @ (C2, thw) -> (Cout, thw)
    y = (jnp.dot(w1_ref[...], x_ref[0], preferred_element_type=jnp.float32)
         + jnp.dot(w2_ref[...], s_ref[0], preferred_element_type=jnp.float32))

    if hw % thw != 0:
        # Mask out-of-range spatial columns of the tail block (select, so any
        # garbage/NaN in the padded input region cannot leak into the stats).
        col = j * thw + jax.lax.broadcasted_iota(jnp.int32, y.shape, 1)
        y = jnp.where(col < hw, y, 0.0)

    @pl.when(j == 0)
    def _():
        csum_ref[...] = jnp.zeros_like(csum_ref)
        csq_ref[...] = jnp.zeros_like(csq_ref)

    # Cross-lane reduce (XLU slot, free next to the VPU/MXU work); accumulator
    # stays VMEM-resident across the spatial ("arbitrary") axis, written back
    # to HBM once per batch image.
    csum_ref[...] += jnp.sum(y, axis=1, keepdims=True)[None]
    csq_ref[...] += jnp.sum(y * y, axis=1, keepdims=True)[None]


def _conv_bn_act_kernel(x_ref, s_ref, w1_ref, w2_ref, scale_ref, shift_ref, o_ref):
    """Recompute the tiny 1x1 conv, apply BN affine + leaky_relu(0.1)."""
    y = (jnp.dot(w1_ref[...], x_ref[0], preferred_element_type=jnp.float32)
         + jnp.dot(w2_ref[...], s_ref[0], preferred_element_type=jnp.float32))
    z = y * scale_ref[...] + shift_ref[...]        # (Cout, 1) broadcasts over lanes
    # leaky_relu with slope in [0, 1): max(z, slope*z).
    o_ref[...] = jnp.maximum(z, NEG_SLOPE * z).astype(o_ref.dtype)[None]


def _pick_spatial_tile(hw, c_total, budget_bytes=4 << 20):
    """Largest lane-dense spatial tile whose f32 double-buffered working set
    (all in/out channel slabs) stays under `budget_bytes`."""
    bytes_per_col = 4 * max(c_total, 1)                     # f32 per lane column
    max_cols = (budget_bytes // (2 * bytes_per_col)) // 128 * 128
    max_cols = max(512, min(max_cols, 16384))
    if hw <= max_cols:
        return hw            # block == full spatial extent: always legal, no tail
    return max_cols          # multiple of 128 -> lane-dense, unmasked stores


@jax.jit
def skip_connection(input_op, skip_op, w, gamma, beta):
    """input_op: (N, C1, H, W), skip_op: (N, C2, H, W)   [NCHW, like PyTorch]
       w:     (Cout, C1 + C2)  -- PyTorch Conv2d 1x1 weight (kernel dims squeezed)
       gamma, beta: (Cout,) BatchNorm affine params.
       Returns (N, Cout, H, W); BatchNorm uses training-mode batch statistics."""
    N, C1, H, Wsp = input_op.shape
    C2 = skip_op.shape[1]
    Cout = w.shape[0]
    HW = H * Wsp
    thw = _pick_spatial_tile(HW, C1 + C2 + Cout)
    nb = pl.cdiv(HW, thw)
    out_dtype = input_op.dtype

    # Free reshapes (contiguous) -- no transposes, no layout shuffles in HBM.
    x = input_op.reshape(N, C1, HW).astype(jnp.float32)
    s = skip_op.reshape(N, C2, HW).astype(jnp.float32)
    w1t = w[:, :C1].astype(jnp.float32)    # (Cout, C1)
    w2t = w[:, C1:].astype(jnp.float32)    # (Cout, C2)

    # ---- Pass 1: per-channel batch statistics (per-n partial accumulators) ----
    csum, csq = pl.pallas_call(
        functools.partial(_stats_kernel, hw=HW, thw=thw),
        out_shape=(jax.ShapeDtypeStruct((N, Cout, 1), jnp.float32),
                   jax.ShapeDtypeStruct((N, Cout, 1), jnp.float32)),
        grid_spec=pltpu.PrefetchScalarGridSpec(
            num_scalar_prefetch=0,
            grid=(N, nb),
            in_specs=[pl.BlockSpec((1, C1, thw), lambda n, j: (n, 0, j)),
                      pl.BlockSpec((1, C2, thw), lambda n, j: (n, 0, j)),
                      pl.BlockSpec((Cout, C1), lambda n, j: (0, 0)),
                      pl.BlockSpec((Cout, C2), lambda n, j: (0, 0))],
            out_specs=(pl.BlockSpec((1, Cout, 1), lambda n, j: (n, 0, 0)),
                       pl.BlockSpec((1, Cout, 1), lambda n, j: (n, 0, 0)))),
        compiler_params=pltpu.CompilerParams(
            dimension_semantics=("parallel", "arbitrary")),
    )(x, s, w1t, w2t)

    # ---- Tiny per-channel glue: training-mode BN stats -> scale/shift ----
    count = jnp.float32(N * HW)
    tot_sum = jnp.sum(csum, axis=0)                       # (Cout, 1)
    tot_sq = jnp.sum(csq, axis=0)                         # (Cout, 1)
    mean = tot_sum / count
    # TODO(synk): E[y^2]-E[y]^2 can cancel catastrophically for very large
    # batches / strongly non-centered activations; a shifted/Welford variant
    # would be more robust.  Clamp to >= 0 as a cheap guard.
    var = jnp.maximum(tot_sq / count - mean * mean, 0.0)  # biased var (BN training)
    scale = gamma.reshape(Cout, 1).astype(jnp.float32) * jax.lax.rsqrt(var + BN_EPS)
    shift = beta.reshape(Cout, 1).astype(jnp.float32) - mean * scale

    # ---- Pass 2: recompute conv, normalize + leaky_relu (no y round-trip) ----
    out = pl.pallas_call(
        _conv_bn_act_kernel,
        out_shape=jax.ShapeDtypeStruct((N, Cout, HW), out_dtype),
        grid_spec=pltpu.PrefetchScalarGridSpec(
            num_scalar_prefetch=0,
            grid=(N, nb),
            in_specs=[pl.BlockSpec((1, C1, thw), lambda n, j: (n, 0, j)),
                      pl.BlockSpec((1, C2, thw), lambda n, j: (n, 0, j)),
                      pl.BlockSpec((Cout, C1), lambda n, j: (0, 0)),
                      pl.BlockSpec((Cout, C2), lambda n, j: (0, 0)),
                      pl.BlockSpec((Cout, 1), lambda n, j: (0, 0)),
                      pl.BlockSpec((Cout, 1), lambda n, j: (0, 0))],
            out_specs=pl.BlockSpec((1, Cout, thw), lambda n, j: (n, 0, j))),
        compiler_params=pltpu.CompilerParams(
            dimension_semantics=("parallel", "parallel")),
    )(x, s, w1t, w2t, scale, shift)

    return out.reshape(N, Cout, H, Wsp)


def _reference(input_op, skip_op, w, gamma, beta):
    xc = jnp.concatenate([input_op, skip_op], axis=1)         # NCHW
    y = jnp.einsum("nchw,oc->nohw", xc, w)                    # 1x1 conv, no bias
    mean = y.mean(axis=(0, 2, 3), keepdims=True)
    var = y.var(axis=(0, 2, 3), keepdims=True)                # biased
    z = (y - mean) / jnp.sqrt(var + BN_EPS)
    z = z * gamma.reshape(1, -1, 1, 1) + beta.reshape(1, -1, 1, 1)
    return jnp.where(z >= 0, z, NEG_SLOPE * z)


if __name__ == "__main__":
    key = jax.random.PRNGKey(0)
    k1, k2, k3, k4, k5 = jax.random.split(key, 5)

    N, H, Wsp = 2, 16, 16
    C1, C2 = 4, 4          # input_op / skip_op channels; in_filters = C1 + C2
    Cout = 8               # out_filters

    input_op = jax.random.normal(k1, (N, C1, H, Wsp), dtype=jnp.float32)
    skip_op = jax.random.normal(k2, (N, C2, H, Wsp), dtype=jnp.float32)

    # PyTorch conv weight is (Cout, Cin, 1, 1); we pass it with the 1x1 kernel
    # dims squeezed: (Cout, Cin).
    w = 0.1 * jax.random.normal(k3, (Cout, C1 + C2), dtype=jnp.float32)
    gamma = 1.0 + 0.1 * jax.random.normal(k4, (Cout,), dtype=jnp.float32)
    beta = 0.1 * jax.random.normal(k5, (Cout,), dtype=jnp.float32)

    out = skip_connection(input_op, skip_op, w, gamma, beta)
    out = jax.block_until_ready(out)

    ref = _reference(input_op, skip_op, w, gamma, beta)
    assert out.shape == (N, Cout, H, Wsp)
    assert jnp.allclose(out, ref, atol=1e-4, rtol=1e-4), "mismatch vs reference"

    print("KERNEL_OK")
</pallas_src>

<mosaic_0001>
module attributes {stable_mosaic.version = 11 : i64} {
  func.func @_stats_kernel(%arg0: i32, %arg1: i32, %arg2: memref<1x4x256xf32, #tpu.memory_space<vmem>>, %arg3: memref<1x4x256xf32, #tpu.memory_space<vmem>>, %arg4: memref<8x4xf32, #tpu.memory_space<vmem>>, %arg5: memref<8x4xf32, #tpu.memory_space<vmem>>, %arg6: memref<1x8x1xf32, #tpu.memory_space<vmem>>, %arg7: memref<1x8x1xf32, #tpu.memory_space<vmem>>) attributes {dimension_semantics = [#tpu.dimension_semantics<parallel>, #tpu.dimension_semantics<arbitrary>], iteration_bounds = array<i64: 2, 1>, scalar_prefetch = 0 : i64, scratch_operands = 0 : i64, tpu.core_type = #tpu.core_type<tc>, window_params = [{transform_indices = @transform_0, window_bounds = array<i64: 1, 4, 256>}, {transform_indices = @transform_1, window_bounds = array<i64: 1, 4, 256>}, {pipeline_mode = #tpu.pipeline_mode<synchronous>, transform_indices = @transform_2, window_bounds = array<i64: 8, 4>}, {pipeline_mode = #tpu.pipeline_mode<synchronous>, transform_indices = @transform_3, window_bounds = array<i64: 8, 4>}, {transform_indices = @transform_4, window_bounds = array<i64: 1, 8, 1>}, {transform_indices = @transform_5, window_bounds = array<i64: 1, 8, 1>}]} {
    %c0 = arith.constant 0 : index
    %c0_0 = arith.constant 0 : index
    %0 = vector.load %arg4[%c0, %c0_0] : memref<8x4xf32, #tpu.memory_space<vmem>>, vector<8x4xf32>
    %c0_1 = arith.constant 0 : index
    %c0_2 = arith.constant 0 : index
    %c0_3 = arith.constant 0 : index
    %1 = vector.load %arg2[%c0_1, %c0_2, %c0_3] : memref<1x4x256xf32, #tpu.memory_space<vmem>>, vector<1x4x256xf32>
    %2 = vector.shape_cast %1 : vector<1x4x256xf32> to vector<4x256xf32>
    %cst = arith.constant dense<0.000000e+00> : vector<8x256xf32>
    %3 = tpu.matmul %0, %2, %cst {dimension_numbers = #tpu.dot_dimension_numbers<[1], [0], [0], [1], [0, 0, 1, 1], [], []>} : vector<8x4xf32>, vector<4x256xf32>, vector<8x256xf32> -> vector<8x256xf32>
    %c0_4 = arith.constant 0 : index
    %c0_5 = arith.constant 0 : index
    %4 = vector.load %arg5[%c0_4, %c0_5] : memref<8x4xf32, #tpu.memory_space<vmem>>, vector<8x4xf32>
    %c0_6 = arith.constant 0 : index
    %c0_7 = arith.constant 0 : index
    %c0_8 = arith.constant 0 : index
    %5 = vector.load %arg3[%c0_6, %c0_7, %c0_8] : memref<1x4x256xf32, #tpu.memory_space<vmem>>, vector<1x4x256xf32>
    %6 = vector.shape_cast %5 : vector<1x4x256xf32> to vector<4x256xf32>
    %cst_9 = arith.constant dense<0.000000e+00> : vector<8x256xf32>
    %7 = tpu.matmul %4, %6, %cst_9 {dimension_numbers = #tpu.dot_dimension_numbers<[1], [0], [0], [1], [0, 0, 1, 1], [], []>} : vector<8x4xf32>, vector<4x256xf32>, vector<8x256xf32> -> vector<8x256xf32>
    %8 = arith.addf %3, %7 : vector<8x256xf32>
    %c0_i32 = arith.constant 0 : i32
    %9 = arith.cmpi eq, %arg1, %c0_i32 : i32
    %10 = arith.extui %9 : i1 to i32
    %c0_i32_10 = arith.constant 0 : i32
    %11 = arith.cmpi ne, %10, %c0_i32_10 : i32
    scf.if %11 {
      %cst_25 = arith.constant 0.000000e+00 : f32
      %25 = vector.broadcast %cst_25 : f32 to vector<1x8x1xf32>
      %c0_26 = arith.constant 0 : index
      %c0_27 = arith.constant 0 : index
      %c0_28 = arith.constant 0 : index
      %26 = vector.load %arg6[%c0_26, %c0_27, %c0_28] : memref<1x8x1xf32, #tpu.memory_space<vmem>>, vector<1x8x1xf32>
      tpu.vector_store %arg6[%c0_26, %c0_27, %c0_28], %25 {strides = array<i32>} : memref<1x8x1xf32, #tpu.memory_space<vmem>>, vector<1x8x1xf32>,
      %cst_29 = arith.constant 0.000000e+00 : f32
      %27 = vector.broadcast %cst_29 : f32 to vector<1x8x1xf32>
      %c0_30 = arith.constant 0 : index
      %c0_31 = arith.constant 0 : index
      %c0_32 = arith.constant 0 : index
      %28 = vector.load %arg7[%c0_30, %c0_31, %c0_32] : memref<1x8x1xf32, #tpu.memory_space<vmem>>, vector<1x8x1xf32>
      tpu.vector_store %arg7[%c0_30, %c0_31, %c0_32], %27 {strides = array<i32>} : memref<1x8x1xf32, #tpu.memory_space<vmem>>, vector<1x8x1xf32>,
    } else {
    }
    %c0_11 = arith.constant 0 : index
    %c0_12 = arith.constant 0 : index
    %c0_13 = arith.constant 0 : index
    %12 = vector.load %arg6[%c0_11, %c0_12, %c0_13] : memref<1x8x1xf32, #tpu.memory_space<vmem>>, vector<1x8x1xf32>
    %cst_14 = arith.constant dense<0.000000e+00> : vector<8xf32>
    %13 = vector.multi_reduction <add>, %8, %cst_14 [1] : vector<8x256xf32> to vector<8xf32>
    %14 = vector.shape_cast %13 : vector<8xf32> to vector<8x1xf32>
    %15 = vector.shape_cast %14 : vector<8x1xf32> to vector<1x8x1xf32>
    %16 = arith.addf %12, %15 : vector<1x8x1xf32>
    %c0_15 = arith.constant 0 : index
    %c0_16 = arith.constant 0 : index
    %c0_17 = arith.constant 0 : index
    %17 = vector.load %arg6[%c0_15, %c0_16, %c0_17] : memref<1x8x1xf32, #tpu.memory_space<vmem>>, vector<1x8x1xf32>
    tpu.vector_store %arg6[%c0_15, %c0_16, %c0_17], %16 {strides = array<i32>} : memref<1x8x1xf32, #tpu.memory_space<vmem>>, vector<1x8x1xf32>,
    %c0_18 = arith.constant 0 : index
    %c0_19 = arith.constant 0 : index
    %c0_20 = arith.constant 0 : index
    %18 = vector.load %arg7[%c0_18, %c0_19, %c0_20] : memref<1x8x1xf32, #tpu.memory_space<vmem>>, vector<1x8x1xf32>
    %19 = arith.mulf %8, %8 : vector<8x256xf32>
    %cst_21 = arith.constant dense<0.000000e+00> : vector<8xf32>
    %20 = vector.multi_reduction <add>, %19, %cst_21 [1] : vector<8x256xf32> to vector<8xf32>
    %21 = vector.shape_cast %20 : vector<8xf32> to vector<8x1xf32>
    %22 = vector.shape_cast %21 : vector<8x1xf32> to vector<1x8x1xf32>
    %23 = arith.addf %18, %22 : vector<1x8x1xf32>
    %c0_22 = arith.constant 0 : index
    %c0_23 = arith.constant 0 : index
    %c0_24 = arith.constant 0 : index
    %24 = vector.load %arg7[%c0_22, %c0_23, %c0_24] : memref<1x8x1xf32, #tpu.memory_space<vmem>>, vector<1x8x1xf32>
    tpu.vector_store %arg7[%c0_22, %c0_23, %c0_24], %23 {strides = array<i32>} : memref<1x8x1xf32, #tpu.memory_space<vmem>>, vector<1x8x1xf32>,
    return
  }
  func.func @transform_0(%arg0: i32, %arg1: i32) -> (i32, i32, i32) {
    %c0_i32 = arith.constant 0 : i32
    %c0_i32_0 = arith.constant 0 : i32
    return %arg0, %c0_i32, %arg1 : i32, i32, i32
  }
  func.func @transform_1(%arg0: i32, %arg1: i32) -> (i32, i32, i32) {
    %c0_i32 = arith.constant 0 : i32
    %c0_i32_0 = arith.constant 0 : i32
    return %arg0, %c0_i32, %arg1 : i32, i32, i32
  }
  func.func @transform_2(%arg0: i32, %arg1: i32) -> (i32, i32) {
    %c0_i32 = arith.constant 0 : i32
    %c0_i32_0 = arith.constant 0 : i32
    %c0_i32_1 = arith.constant 0 : i32
    return %c0_i32, %c0_i32_0 : i32, i32
  }
  func.func @transform_3(%arg0: i32, %arg1: i32) -> (i32, i32) {
    %c0_i32 = arith.constant 0 : i32
    %c0_i32_0 = arith.constant 0 : i32
    %c0_i32_1 = arith.constant 0 : i32
    return %c0_i32, %c0_i32_0 : i32, i32
  }
  func.func @transform_4(%arg0: i32, %arg1: i32) -> (i32, i32, i32) {
    %c0_i32 = arith.constant 0 : i32
    %c0_i32_0 = arith.constant 0 : i32
    %c0_i32_1 = arith.constant 0 : i32
    return %arg0, %c0_i32, %c0_i32_0 : i32, i32, i32
  }
  func.func @transform_5(%arg0: i32, %arg1: i32) -> (i32, i32, i32) {
    %c0_i32 = arith.constant 0 : i32
    %c0_i32_0 = arith.constant 0 : i32
    %c0_i32_1 = arith.constant 0 : i32
    return %arg0, %c0_i32, %c0_i32_0 : i32, i32, i32
  }
}

module attributes {stable_mosaic.version = 11 : i64} {
  func.func @_conv_bn_act_kernel(%arg0: i32, %arg1: i32, %arg2: memref<1x4x256xf32, #tpu.memory_space<vmem>>, %arg3: memref<1x4x256xf32, #tpu.memory_space<vmem>>, %arg4: memref<8x4xf32, #tpu.memory_space<vmem>>, %arg5: memref<8x4xf32, #tpu.memory_space<vmem>>, %arg6: memref<8x1xf32, #tpu.memory_space<vmem>>, %arg7: memref<8x1xf32, #tpu.memory_space<vmem>>, %arg8: memref<1x8x256xf32, #tpu.memory_space<vmem>>) attributes {dimension_semantics = [#tpu.dimension_semantics<parallel>, #tpu.dimension_semantics<parallel>], iteration_bounds = array<i64: 2, 1>, scalar_prefetch = 0 : i64, scratch_operands = 0 : i64, tpu.core_type = #tpu.core_type<tc>, window_params = [{transform_indices = @transform_0, window_bounds = array<i64: 1, 4, 256>}, {transform_indices = @transform_1, window_bounds = array<i64: 1, 4, 256>}, {pipeline_mode = #tpu.pipeline_mode<synchronous>, transform_indices = @transform_2, window_bounds = array<i64: 8, 4>}, {pipeline_mode = #tpu.pipeline_mode<synchronous>, transform_indices = @transform_3, window_bounds = array<i64: 8, 4>}, {pipeline_mode = #tpu.pipeline_mode<synchronous>, transform_indices = @transform_4, window_bounds = array<i64: 8, 1>}, {pipeline_mode = #tpu.pipeline_mode<synchronous>, transform_indices = @transform_5, window_bounds = array<i64: 8, 1>}, {transform_indices = @transform_6, window_bounds = array<i64: 1, 8, 256>}]} {
    %c0 = arith.constant 0 : index
    %c0_0 = arith.constant 0 : index
    %0 = vector.load %arg4[%c0, %c0_0] : memref<8x4xf32, #tpu.memory_space<vmem>>, vector<8x4xf32>
    %c0_1 = arith.constant 0 : index
    %c0_2 = arith.constant 0 : index
    %c0_3 = arith.constant 0 : index
    %1 = vector.load %arg2[%c0_1, %c0_2, %c0_3] : memref<1x4x256xf32, #tpu.memory_space<vmem>>, vector<1x4x256xf32>
    %2 = vector.shape_cast %1 : vector<1x4x256xf32> to vector<4x256xf32>
    %cst = arith.constant dense<0.000000e+00> : vector<8x256xf32>
    %3 = tpu.matmul %0, %2, %cst {dimension_numbers = #tpu.dot_dimension_numbers<[1], [0], [0], [1], [0, 0, 1, 1], [], []>} : vector<8x4xf32>, vector<4x256xf32>, vector<8x256xf32> -> vector<8x256xf32>
    %c0_4 = arith.constant 0 : index
    %c0_5 = arith.constant 0 : index
    %4 = vector.load %arg5[%c0_4, %c0_5] : memref<8x4xf32, #tpu.memory_space<vmem>>, vector<8x4xf32>
    %c0_6 = arith.constant 0 : index
    %c0_7 = arith.constant 0 : index
    %c0_8 = arith.constant 0 : index
    %5 = vector.load %arg3[%c0_6, %c0_7, %c0_8] : memref<1x4x256xf32, #tpu.memory_space<vmem>>, vector<1x4x256xf32>
    %6 = vector.shape_cast %5 : vector<1x4x256xf32> to vector<4x256xf32>
    %cst_9 = arith.constant dense<0.000000e+00> : vector<8x256xf32>
    %7 = tpu.matmul %4, %6, %cst_9 {dimension_numbers = #tpu.dot_dimension_numbers<[1], [0], [0], [1], [0, 0, 1, 1], [], []>} : vector<8x4xf32>, vector<4x256xf32>, vector<8x256xf32> -> vector<8x256xf32>
    %8 = arith.addf %3, %7 : vector<8x256xf32>
    %c0_10 = arith.constant 0 : index
    %c0_11 = arith.constant 0 : index
    %9 = vector.load %arg6[%c0_10, %c0_11] : memref<8x1xf32, #tpu.memory_space<vmem>>, vector<8x1xf32>
    %10 = vector.broadcast %9 : vector<8x1xf32> to vector<8x256xf32>
    %11 = arith.mulf %8, %10 : vector<8x256xf32>
    %c0_12 = arith.constant 0 : index
    %c0_13 = arith.constant 0 : index
    %12 = vector.load %arg7[%c0_12, %c0_13] : memref<8x1xf32, #tpu.memory_space<vmem>>, vector<8x1xf32>
    %13 = vector.broadcast %12 : vector<8x1xf32> to vector<8x256xf32>
    %14 = arith.addf %11, %13 : vector<8x256xf32>
    %cst_14 = arith.constant 1.000000e-01 : f32
    %15 = vector.broadcast %cst_14 : f32 to vector<8x256xf32>
    %16 = arith.mulf %15, %14 : vector<8x256xf32>
    %17 = arith.maximumf %14, %16 : vector<8x256xf32>
    %18 = vector.shape_cast %17 : vector<8x256xf32> to vector<1x8x256xf32>
    %c0_15 = arith.constant 0 : index
    %c0_16 = arith.constant 0 : index
    %c0_17 = arith.constant 0 : index
    %19 = vector.load %arg8[%c0_15, %c0_16, %c0_17] : memref<1x8x256xf32, #tpu.memory_space<vmem>>, vector<1x8x256xf32>
    tpu.vector_store %arg8[%c0_15, %c0_16, %c0_17], %18 {strides = array<i32>} : memref<1x8x256xf32, #tpu.memory_space<vmem>>, vector<1x8x256xf32>,
    return
  }
  func.func @transform_0(%arg0: i32, %arg1: i32) -> (i32, i32, i32) {
    %c0_i32 = arith.constant 0 : i32
    %c0_i32_0 = arith.constant 0 : i32
    return %arg0, %c0_i32, %arg1 : i32, i32, i32
  }
  func.func @transform_1(%arg0: i32, %arg1: i32) -> (i32, i32, i32) {
    %c0_i32 = arith.constant 0 : i32
    %c0_i32_0 = arith.constant 0 : i32
    return %arg0, %c0_i32, %arg1 : i32, i32, i32
  }
  func.func @transform_2(%arg0: i32, %arg1: i32) -> (i32, i32) {
    %c0_i32 = arith.constant 0 : i32
    %c0_i32_0 = arith.constant 0 : i32
    %c0_i32_1 = arith.constant 0 : i32
    return %c0_i32, %c0_i32_0 : i32, i32
  }
  func.func @transform_3(%arg0: i32, %arg1: i32) -> (i32, i32) {
    %c0_i32 = arith.constant 0 : i32
    %c0_i32_0 = arith.constant 0 : i32
    %c0_i32_1 = arith.constant 0 : i32
    return %c0_i32, %c0_i32_0 : i32, i32
  }
  func.func @transform_4(%arg0: i32, %arg1: i32) -> (i32, i32) {
    %c0_i32 = arith.constant 0 : i32
    %c0_i32_0 = arith.constant 0 : i32
    %c0_i32_1 = arith.constant 0 : i32
    return %c0_i32, %c0_i32_0 : i32, i32
  }
  func.func @transform_5(%arg0: i32, %arg1: i32) -> (i32, i32) {
    %c0_i32 = arith.constant 0 : i32
    %c0_i32_0 = arith.constant 0 : i32
    %c0_i32_1 = arith.constant 0 : i32
    return %c0_i32, %c0_i32_0 : i32, i32
  }
  func.func @transform_6(%arg0: i32, %arg1: i32) -> (i32, i32, i32) {
    %c0_i32 = arith.constant 0 : i32
    %c0_i32_0 = arith.constant 0 : i32
    return %arg0, %c0_i32, %arg1 : i32, i32, i32
  }
}

</mosaic_0001>

<bundles_post_ra>
// kernel: skip_connection.2
= control target key start
LH: loop header
LB: loop body
LE: loop exit
PB: predicated region body
PF: predicated region fallthrough
CT: control target
= control target key end

     0   :  { %s707_s18 = smov 0   ;;  %s709_s19 = smov 0   ;;  %s762_s0 = inlined_call_operand.vmem [shape: f32[2,4,256], index: 0, kind: input, shape index: {}]   ;;  %s763_s1 = inlined_call_operand.vmem [shape: f32[2,4,256], index: 1, kind: input, shape index: {}]   ;;  %s764_s2 = inlined_call_operand.vmem [shape: f32[8,4], index: 2, kind: input, shape index: {}]   ;;  %s765_s3 = inlined_call_operand.vmem [shape: f32[8,4], index: 3, kind: input, shape index: {}]   ;;  %s766_s4 = inlined_call_operand.vmem [shape: f32[2,8,1], index: 4, kind: output, shape index: {0}]   ;;  %s767_s5 = inlined_call_operand.vmem [shape: f32[2,8,1], index: 5, kind: output, shape index: {1}]  }
   0x1   :  { %s711_s20 = smov 0  }
   0x2 LB: > { %s28_s21 = sadd.s32 1, %s670_s19  ;;  %p606_p0 = scmp.ge.s32.totalorder %s674_s20, 1  ;;  %s674_s20 = sphi %s711_s20, %s16_s20   ;;  %s670_s19 = sphi %s709_s19, %s769_s19   ;;  %s666_s18 = sphi %s707_s18, %s768_s18  }
   0x3   : > { %p30_p1 = scmp.ge.s32.totalorder %s28_s21, 2  ;;  %p226_p2 = scmp.lt.s32.totalorder %s674_s20, 3 }
   0x5   : > { %s771_s21 = smov (%p30_p1, %s28_s21), 0  ;;  %p227_p3 = pnand %p606_p0, %p226_p2 }
   0x6   : > { %p271_p4 = scmp.lt.s32.totalorder (!%p227_p3), %s666_s18, 1  ;;  %v676_v0 = vmov (!%p227_p3), 0.0   ;;  %vm308_vm0 = vcmask (!%p227_p3), 1043456   ;;  %v300_v5 = vld [vmem:[%s765_s3] sm:$0xff] (!%p227_p3)  ;;  %vm304_vm1 = vcmask (!%p227_p3), 31744   ;;  %vm468_vm2 = vcmask (!%p227_p3), 7168  }
   0x7   : > { %230 = sbr.rel (%p227_p3) target bundleno = 389 (0x185), region = 36  ;;  %377 = vmatprep.mubr.f32.mxu1 (!%p227_p3), %v676_v0  ;;  %457 = vmatprep.mubr.f32.mxu0 (!%p227_p3), %v676_v0  ;;  %v298_v6 = vld [vmem:[%s764_s2] sm:$0xff] (!%p227_p3) }
   0xe   : > { %s773_s18 = smov (!%p271_p4, %s666_s18), 1 }
   0xf   : > { %s725_s22 = sshll.u32 %s773_s18, 3 }
  0x10   : > { %s288_s25 = scalar_lea.vmem %s763_s1, %s725_s22  ;;  %s278_s28 = scalar_lea.vmem %s762_s0, %s725_s22 }
  0x11   : > { %v301_v1 = vld [vmem:[%s288_s25] sm:$0xff]  ;;  %s293_s10 = scalar_lea.vmem %s766_s4, %s725_s22  ;;  %s297_s13 = scalar_lea.vmem %s767_s5, %s725_s22 }
  0x12   : > { %v299_v2 = vld [vmem:[%s278_s28] sm:$0xff]  ;;  %v303_v3 = vcombine.high %v301_v1, %v301_v1  ;;  %469 = vst.msk [vmem:[%s293_s10] sm:$0xff] %vm468_vm2, %v676_v0  ;;  %470 = vst.msk [vmem:[%s297_s13] sm:$0xff] %vm468_vm2, %v676_v0 }
  0x13   : > { %v385_v4 = vcombine.high %v299_v2, %v299_v2 }
  0x14   : > { %613 = vmatprep.subr.msk.mxu1 %vm308_vm0, %v303_v3 }
  0x15   : > { %616 = vmatprep.subr.msk.mxu0 %vm308_vm0, %v385_v4  ;;  %614 = vmatpush1.msk.msra.mxu1 %vm308_vm0, %v301_v1 }
  0x16   : > { %617 = vmatpush1.msk.msra.mxu0 %vm308_vm0, %v299_v2  ;;  %615 = vmatmul.mubr.msk.f32.vlgmr.msra.gmra.mrb[0].mxu1 %vm304_vm1, %v300_v5 }
  0x17   : > { %618 = vmatmul.mubr.msk.f32.vlgmr.msra.gmra.mrb[0].mxu0 %vm304_vm1, %v298_v6 }
  0x19   : > { %v471_v17 = vld [vmem:[%s293_s10] sm:$0xff] }
  0x1a   : > { %v478_v20 = vld [vmem:[%s297_s13] sm:$0xff] }
  0xe9   : > { %v379_v7 = vpop.f32.mrb[0].mxu1 }
  0xea   : > { %v459_v8 = vpop.f32.mrb[0].mxu0  ;;  %v381_v10 = vpop.f32.mrb[1].mxu1 }
  0xeb   : > { %v460_v9 = vadd.f32 %v459_v8, %v379_v7  ;;  %v461_v11 = vpop.f32.mrb[1].mxu0 }
  0xec   : > { %v462_v12 = vadd.f32 %v461_v11, %v381_v10 }
  0xed   : > { %v479_v13 = vmul.f32 %v460_v9, %v460_v9 }
  0xee   : > { %v480_v14 = vmul.f32 %v462_v12, %v462_v12  ;;  %v472_v15 = vadd.f32 %v462_v12, %v460_v9 }
  0xf0   : > { %473 = vadd.xlane.f32.xlu0 %v472_v15  ;;  %v481_v16 = vadd.f32 %v480_v14, %v479_v13 }
  0xf4   : > { %482 = vadd.xlane.f32.xlu0 %v481_v16 }
 0x17d   : > { %v474_v18 = vpop.xlane.xlu0 %473 }
 0x17e   : > { %v475_v19 = vadd.f32 %v474_v18, %v471_v17 }
 0x180   : > { %477 = vst.msk [vmem:[%s293_s10] sm:$0xff] %vm468_vm2, %v475_v19 }
 0x181   : > { %v483_v21 = vpop.xlane.xlu0 %482 }
 0x182   : > { %v484_v22 = vadd.f32 %v483_v21, %v478_v20 }
 0x184   : > { %485 = vst.msk [vmem:[%s297_s13] sm:$0xff] %vm468_vm2, %v484_v22 }
 0x185 PF: > { %s16_s20 = sadd.s32 1, %s674_s20   ;;  %s768_s18 = smov %s670_s19 }
 0x186   : > { %p13_p5 = scmp.ge.s32.totalorder %s16_s20, 4   ;;  %s769_s19 = smov %s771_s21 }
 0x188   :  { %15 = sbr.rel (!%p13_p5) target bundleno = 2 (0x2), region = 85 }

// kernel: skip_connection.3
= control target key start
LH: loop header
LB: loop body
LE: loop exit
PB: predicated region body
PF: predicated region fallthrough
CT: control target
= control target key end

     0   :  { %s734_s21 = smov 0   ;;  %s736_s22 = smov 0   ;;  %s786_s0 = inlined_call_operand.vmem [shape: f32[2,4,256], index: 0, kind: input, shape index: {}]   ;;  %s787_s1 = inlined_call_operand.vmem [shape: f32[2,4,256], index: 1, kind: input, shape index: {}]   ;;  %s788_s2 = inlined_call_operand.vmem [shape: f32[8,4], index: 2, kind: input, shape index: {}]   ;;  %s789_s3 = inlined_call_operand.vmem [shape: f32[8,4], index: 3, kind: input, shape index: {}]   ;;  %s790_s4 = inlined_call_operand.vmem [shape: f32[8,1], index: 4, kind: input, shape index: {}]   ;;  %s791_s5 = inlined_call_operand.vmem [shape: f32[8,1], index: 5, kind: input, shape index: {}]   ;;  %s792_s6 = inlined_call_operand.vmem [shape: f32[2,8,256], index: 6, kind: output, shape index: {}]  }
   0x1   :  { %s738_s23 = smov 0  }
   0x2 LB: > { %s28_s24 = sadd.s32 1, %s691_s22  ;;  %p624_p0 = scmp.ge.s32.totalorder %s695_s23, 1  ;;  %s695_s23 = sphi %s738_s23, %s16_s23   ;;  %s691_s22 = sphi %s736_s22, %s794_s22   ;;  %s687_s21 = sphi %s734_s21, %s793_s21  }
   0x3   : > { %p30_p1 = scmp.ge.s32.totalorder %s28_s24, 2  ;;  %p250_p2 = scmp.lt.s32.totalorder %s695_s23, 3 }
   0x5   : > { %s796_s24 = smov (%p30_p1, %s28_s24), 0  ;;  %p251_p3 = pnand %p624_p0, %p250_p2 }
   0x6   : > { %p298_p4 = scmp.lt.s32.totalorder (!%p251_p3), %s687_s21, 1  ;;  %v697_v0 = vmov (!%p251_p3), 0.0   ;;  %v493_v1 = vld [vmem:[%s790_s4] sm:$0xff] (!%p251_p3)  ;;  %v698_v2 = vmov (!%p251_p3), 0   ;;  %vm337_vm0 = vcmask (!%p251_p3), 1043456   ;;  %vm333_vm1 = vcmask (!%p251_p3), 31744  }
   0x7   : > { %254 = sbr.rel (%p251_p3) target bundleno = 247 (0xf7), region = 44  ;;  %406 = vmatprep.mubr.f32.mxu1 (!%p251_p3), %v697_v0  ;;  %486 = vmatprep.mubr.f32.mxu0 (!%p251_p3), %v697_v0  ;;  %v501_v3 = vld [vmem:[%s791_s5] sm:$0xff] (!%p251_p3) }
   0x8   : > { %670 = vset.pattern.permute.xlu0 (!%p251_p3), %v698_v2  ;;  %v329_v8 = vld [vmem:[%s789_s3] sm:$0xff] (!%p251_p3) }
   0x9   : > { %496 = vperm.xlu0 (!%p251_p3), %670, %v493_v1   ;;  %v327_v9 = vld [vmem:[%s788_s2] sm:$0xff] (!%p251_p3) }
   0xd   : > { %504 = vperm.xlu0 (!%p251_p3), %670, %v501_v3  }
   0xe   : > { %s798_s21 = smov (!%p298_p4, %s687_s21), 1 }
   0xf   : > { %s639_s27 = sshll.u32 %s798_s21, 3  ;;  %s641_s16 = sshll.u32 %s798_s21, 4 }
  0x10   : > { %s315_s8 = scalar_lea.vmem %s787_s1, %s639_s27  ;;  %s305_s11 = scalar_lea.vmem %s786_s0, %s639_s27 }
  0x11   : > { %v330_v4 = vld [vmem:[%s315_s8] sm:$0xff]  ;;  %s325_s19 = scalar_lea.vmem %s792_s6, %s641_s16 }
  0x12   : > { %v328_v5 = vld [vmem:[%s305_s11] sm:$0xff]  ;;  %v332_v6 = vcombine.high %v330_v4, %v330_v4 }
  0x13   : > { %v414_v7 = vcombine.high %v328_v5, %v328_v5 }
  0x14   : > { %631 = vmatprep.subr.msk.mxu1 %vm337_vm0, %v332_v6 }
  0x15   : > { %634 = vmatprep.subr.msk.mxu0 %vm337_vm0, %v414_v7  ;;  %632 = vmatpush1.msk.msra.mxu1 %vm337_vm0, %v330_v4 }
  0x16   : > { %635 = vmatpush1.msk.msra.mxu0 %vm337_vm0, %v328_v5  ;;  %633 = vmatmul.mubr.msk.f32.vlgmr.msra.gmra.mrb[0].mxu1 %vm333_vm1, %v329_v8 }
  0x17   : > { %636 = vmatmul.mubr.msk.f32.vlgmr.msra.gmra.mrb[0].mxu0 %vm333_vm1, %v327_v9 }
  0x88   : > { %v497_v10 = vpop.permute.xlu0 %496 }
  0x8c   : > { %v505_v18 = vpop.permute.xlu0 %504 }
  0xe9   : > { %v408_v11 = vpop.f32.mrb[0].mxu1 }
  0xea   : > { %v488_v12 = vpop.f32.mrb[0].mxu0  ;;  %v410_v14 = vpop.f32.mrb[1].mxu1 }
  0xeb   : > { %v489_v13 = vadd.f32 %v488_v12, %v408_v11  ;;  %v490_v15 = vpop.f32.mrb[1].mxu0 }
  0xec   : > { %v491_v16 = vadd.f32 %v490_v15, %v410_v14 }
  0xed   : > { %v499_v17 = vmul.f32 %v497_v10, %v489_v13 }
  0xee   : > { %v500_v19 = vmul.f32 %v497_v10, %v491_v16 }
  0xef   : > { %v507_v20 = vadd.f32 %v505_v18, %v499_v17 }
  0xf0   : > { %v508_v21 = vadd.f32 %v505_v18, %v500_v19 }
  0xf1   : > { %v509_v22 = vmul.f32 0.1, %v507_v20 }
  0xf2   : > { %v510_v23 = vmul.f32 0.1, %v508_v21 }
  0xf3   : > { %v511_v24 = vmax.f32 %v507_v20, %v509_v22 }
  0xf4   : > { %v512_v25 = vmax.f32 %v508_v21, %v510_v23 }
  0xf5   : > { %513 = vst [vmem:[%s325_s19] sm:$0xff] %v511_v24 }
  0xf6   : > { %514 = vst [vmem:[%s325_s19 + $0x8] sm:$0xff] %v512_v25 }
  0xf7 PF: > { %s16_s23 = sadd.s32 1, %s695_s23   ;;  %s793_s21 = smov %s691_s22 }
  0xf8   : > { %p13_p5 = scmp.ge.s32.totalorder %s16_s23, 4   ;;  %s794_s22 = smov %s796_s24 }
  0xfa   :  { %15 = sbr.rel (!%p13_p5) target bundleno = 2 (0x2), region = 77 }

</bundles_post_ra>
